<compile_context>
chip_gen: v7x
topology: tpu7x:2x2x1
jax: 0.10.0
libtpu: 0.0.40
codegen_flags: <defaults>
</compile_context>

<pallas_src>
import jax
import jax.numpy as jnp
from jax.experimental import pallas as pl
from jax.experimental.pallas import tpu as pltpu


def _attn_pool_kernel_vpu_dot(scal_ref, h_ref, wt_ref, b_ref, v_ref, o_ref):
    """Small/medium-H variant: query dot and pooled sum on the VPU.

    scal_ref: SMEM (2,) f32  -- [||q||, bias . q]
    h_ref:    (TB, S, H)     -- hidden_states tile
    wt_ref:   (H, H) bf16    -- W^T (pre-transposed in the wrapper)
    b_ref:    (1, H) f32     -- bias
    v_ref:    (1, H) f32     -- W^T q
    o_ref:    (TB, H)        -- pooled output tile
    """
    tb, s, h = h_ref.shape
    hidden = h_ref[...]                                        # (TB, S, H)
    hid_f32 = hidden.astype(jnp.float32)
    h_bf = hidden.reshape(tb * s, h).astype(jnp.bfloat16)

    # key = hidden @ W^T + b  -- bf16 MXU matmul, f32 accumulate.
    key = jnp.dot(h_bf, wt_ref[...],
                  preferred_element_type=jnp.float32) + b_ref[...]   # (TB*S, H)
    key3 = key.reshape(tb, s, h)
    key_nsq = jnp.sum(key3 * key3, axis=-1)                    # (TB, S) lane reduce

    # key . q = hidden . (W^T q) + b . q  -- VPU, full f32 (no bf16 error here).
    dots = jnp.sum(hid_f32 * v_ref[...].reshape(1, 1, h), axis=-1) + scal_ref[1]

    q_norm = scal_ref[0]
    scores = dots * pl.reciprocal(q_norm * jnp.sqrt(key_nsq) + 1e-8, approx=True)

    # softmax over the sequence axis, kept lane-dense as (TB, S).
    m = jnp.max(scores, axis=-1, keepdims=True)
    e = jnp.exp(scores - m)
    denom = jnp.sum(e, axis=-1, keepdims=True)
    wgt = e * (1.0 / denom)                                    # exact final divide

    # pooled = sum_s hidden * w : VPU broadcast-multiply + sublane reduce (f32).
    pooled = jnp.sum(hid_f32 * wgt[:, :, None], axis=1)        # (TB, H)
    o_ref[...] = pooled.astype(o_ref.dtype)


def _attn_pool_kernel_fused_dot(scal_ref, h_ref, wa_ref, ba_ref, o_ref):
    """Large-H variant: query dot fused into the projection matmul.

    scal_ref: SMEM (2,) f32  -- [||q||, bias . q]  (only [0] used here)
    h_ref:    (TB, S, H)
    wa_ref:   (H, H+1) bf16  -- columns 0..H-1 = W^T, column H = W^T q
    ba_ref:   (1, H+1) f32   -- columns 0..H-1 = b,   column H = b . q
    o_ref:    (TB, H)
    """
    tb, s, h = h_ref.shape
    hidden = h_ref[...]
    h_bf = hidden.reshape(tb * s, h).astype(jnp.bfloat16)

    # [key, key.q] = hidden @ [W^T, W^T q] + [b, b.q]  -- one bf16 MXU matmul.
    ka = jnp.dot(h_bf, wa_ref[...],
                 preferred_element_type=jnp.float32) + ba_ref[...]   # (TB*S, H+1)
    ka3 = ka.reshape(tb, s, h + 1)

    # Recover key.q and ||key||^2 with masked *logical* lane reductions over the
    # H+1 columns (lane padding is masked; the key slice is never materialized,
    # and no cancellation-prone sum(ka^2) - dots^2 is needed).
    col = jax.lax.broadcasted_iota(jnp.int32, (tb, s, h + 1), 2)
    is_dot_col = col == h
    dots = jnp.sum(jnp.where(is_dot_col, ka3, 0.0), axis=-1)          # (TB, S)
    key_nsq = jnp.sum(jnp.where(is_dot_col, 0.0, ka3 * ka3), axis=-1)  # (TB, S)

    q_norm = scal_ref[0]
    scores = dots * pl.reciprocal(q_norm * jnp.sqrt(key_nsq) + 1e-8, approx=True)

    m = jnp.max(scores, axis=-1, keepdims=True)
    e = jnp.exp(scores - m)
    denom = jnp.sum(e, axis=-1, keepdims=True)
    wgt = (e * (1.0 / denom)).astype(jnp.bfloat16)             # exact final divide

    # pooled = w @ hidden per batch row -- batched bf16 MXU matmul, f32 acc.
    pooled = jnp.einsum('bs,bsh->bh', wgt, hidden.astype(jnp.bfloat16),
                        preferred_element_type=jnp.float32)    # (TB, H)
    o_ref[...] = pooled.astype(o_ref.dtype)


def attention_pooling(hidden_states, weight, bias, query, *, fuse_query_dot=None):
    """hidden_states: (B, S, H); weight: (H, H) [PyTorch nn.Linear (out, in)];
    bias: (H,); query: (H,).  Returns pooled: (B, H)."""
    B, S, H = hidden_states.shape
    if fuse_query_dot is None:
        # Fusing key.q as an extra MXU output column pads a whole lane tile;
        # only worth it once H is large enough that the padding is a few percent.
        fuse_query_dot = H >= 1024

    # ---- adaptive batch tile & VMEM budget (v5e/v6e 128 MiB, v7x 64 MiB/TC) ----
    try:
        vmem_cap = int(pltpu.get_tpu_info().vmem_capacity_bytes)
    except Exception:
        vmem_cap = 64 * 1024 * 1024
    vmem_budget = int(vmem_cap * 0.8)

    in_elt = hidden_states.dtype.itemsize
    # Grid-invariant residents: double-buffered bf16 weight, bias rows, slack.
    fixed = 2 * H * (H + 1) * 2 + 4 * 4 * (H + 8) + (1 << 20)
    # Per batch row per step: 2 pipeline buffers of the hidden tile + ~3 f32-sized
    # in-kernel temporaries (bf16 copy, ka/key, squares) + the output row.
    per_row = S * H * (2 * in_elt + 12) + 2 * H * 4
    tb_cap = max(1, (vmem_budget - fixed) // per_row)

    if B <= 8:
        tb = B                          # full batch: (tb, H) out block legal (tb == B)
        # TODO(synk): if a single (B, S, H) tile overflows VMEM here (very long S
        # on v7x), an S-tiled online-softmax variant is required; not implemented.
    else:
        tb = min(tb_cap, (B + 1) // 2)  # >= 2 grid steps so both v7x TCs get work
        tb = max(8, (tb // 8) * 8)      # (tb, H) output block needs tb % 8 == 0
    grid = (pl.cdiv(B, tb),)

    # ---- parameters in MXU-friendly layout (transposed ONCE in the wrapper) ----
    weight = weight.astype(jnp.float32)
    bias = bias.astype(jnp.float32)
    query = query.astype(jnp.float32)
    v = jnp.dot(query, weight)                                  # (H,) == W^T q
    scal = jnp.stack([jnp.sqrt(jnp.sum(query * query)),         # ||q||
                      jnp.dot(bias, query)]).astype(jnp.float32)

    out_shape = jax.ShapeDtypeStruct((B, H), hidden_states.dtype)
    h_spec = pl.BlockSpec((tb, S, H), lambda i, _s: (i, 0, 0))
    o_spec = pl.BlockSpec((tb, H), lambda i, _s: (i, 0))
    cparams = pltpu.CompilerParams(
        dimension_semantics=("parallel",),
        vmem_limit_bytes=vmem_budget)

    if fuse_query_dot:
        wa = jnp.concatenate([weight.T, v[:, None]], axis=1).astype(jnp.bfloat16)
        ba = jnp.concatenate([bias, jnp.dot(bias, query)[None]])[None, :]
        grid_spec = pltpu.PrefetchScalarGridSpec(
            num_scalar_prefetch=1, grid=grid,
            in_specs=[h_spec,
                      pl.BlockSpec((H, H + 1), lambda i, _s: (0, 0)),
                      pl.BlockSpec((1, H + 1), lambda i, _s: (0, 0))],
            out_specs=o_spec)
        return pl.pallas_call(_attn_pool_kernel_fused_dot, out_shape=out_shape,
                              grid_spec=grid_spec, compiler_params=cparams)(
            scal, hidden_states, wa, ba)

    wt = weight.T.astype(jnp.bfloat16)                          # (H, H) == W^T
    b_row = bias[None, :]                                       # (1, H) f32
    v_row = v[None, :].astype(jnp.float32)                      # (1, H) f32
    grid_spec = pltpu.PrefetchScalarGridSpec(
        num_scalar_prefetch=1, grid=grid,
        in_specs=[h_spec,
                  pl.BlockSpec((H, H), lambda i, _s: (0, 0)),
                  pl.BlockSpec((1, H), lambda i, _s: (0, 0)),
                  pl.BlockSpec((1, H), lambda i, _s: (0, 0))],
        out_specs=o_spec)
    return pl.pallas_call(_attn_pool_kernel_vpu_dot, out_shape=out_shape,
                          grid_spec=grid_spec, compiler_params=cparams)(
        scal, hidden_states, wt, b_row, v_row)


def attention_pooling_ref(hidden_states, weight, bias, query):
    key = jnp.einsum("bsh,oh->bso", hidden_states, weight) + bias
    q_norm = jnp.linalg.norm(query)
    key_norm = jnp.linalg.norm(key, axis=-1)
    scores = jnp.einsum("bso,o->bs", key, query) / (q_norm * key_norm + 1e-8)
    weights = jax.nn.softmax(scores, axis=1)[..., None]
    return jnp.sum(hidden_states * weights, axis=1)


if __name__ == "__main__":
    B, S, H = 2, 8, 32
    key0 = jax.random.PRNGKey(0)
    k1, k2, k3, k4 = jax.random.split(key0, 4)

    hidden_states = jax.random.normal(k1, (B, S, H), dtype=jnp.float32)
    # Deterministic synthetic parameters (shapes from the module __init__):
    query = jax.random.normal(k2, (H,), dtype=jnp.float32)           # nn.Parameter(randn(H))
    weight = jax.random.normal(k3, (H, H), dtype=jnp.float32) * 0.1  # key_proj.weight (H, H)
    bias = jax.random.normal(k4, (H,), dtype=jnp.float32) * 0.1      # key_proj.bias (H,)

    ref = attention_pooling_ref(hidden_states, weight, bias, query)

    # Default path for H=32: VPU query-dot / VPU pooled variant.
    out_small = attention_pooling(hidden_states, weight, bias, query)
    out_small = jax.block_until_ready(out_small)
    assert out_small.shape == (B, H)
    # bf16 MXU projection -> bf16-level tolerance against the f32 reference.
    assert jnp.allclose(out_small, ref, atol=3e-2, rtol=3e-2), (out_small, ref)

    # Also exercise the fused-column (large-H) variant on the same inputs.
    out_fused = attention_pooling(hidden_states, weight, bias, query,
                                  fuse_query_dot=True)
    out_fused = jax.block_until_ready(out_fused)
    assert out_fused.shape == (B, H)
    assert jnp.allclose(out_fused, ref, atol=3e-2, rtol=3e-2), (out_fused, ref)

    print("KERNEL_OK")
</pallas_src>

<mosaic_0001>
module attributes {stable_mosaic.version = 11 : i64} {
  func.func @_attn_pool_kernel_vpu_dot(%arg0: i32, %arg1: memref<2xf32, #tpu.memory_space<smem>>, %arg2: memref<2x8x32xf32, #tpu.memory_space<vmem>>, %arg3: memref<32x32xbf16, #tpu.memory_space<vmem>>, %arg4: memref<1x32xf32, #tpu.memory_space<vmem>>, %arg5: memref<1x32xf32, #tpu.memory_space<vmem>>, %arg6: memref<2x32xf32, #tpu.memory_space<vmem>>) attributes {dimension_semantics = [#tpu.dimension_semantics<parallel>], iteration_bounds = array<i64: 1>, scalar_prefetch = 1 : i64, scratch_operands = 0 : i64, tpu.core_type = #tpu.core_type<tc>, window_params = [{transform_indices = @transform_0, window_bounds = array<i64: 2, 8, 32>}, {pipeline_mode = #tpu.pipeline_mode<synchronous>, transform_indices = @transform_1, window_bounds = array<i64: 32, 32>}, {pipeline_mode = #tpu.pipeline_mode<synchronous>, transform_indices = @transform_2, window_bounds = array<i64: 1, 32>}, {pipeline_mode = #tpu.pipeline_mode<synchronous>, transform_indices = @transform_3, window_bounds = array<i64: 1, 32>}, {transform_indices = @transform_4, window_bounds = array<i64: 2, 32>}]} {
    %c0 = arith.constant 0 : index
    %c0_0 = arith.constant 0 : index
    %c0_1 = arith.constant 0 : index
    %0 = vector.load %arg2[%c0, %c0_0, %c0_1] : memref<2x8x32xf32, #tpu.memory_space<vmem>>, vector<2x8x32xf32>
    %1 = vector.shape_cast %0 : vector<2x8x32xf32> to vector<16x32xf32>
    %2 = arith.truncf %1 : vector<16x32xf32> to vector<16x32xbf16>
    %c0_2 = arith.constant 0 : index
    %c0_3 = arith.constant 0 : index
    %3 = vector.load %arg3[%c0_2, %c0_3] : memref<32x32xbf16, #tpu.memory_space<vmem>>, vector<32x32xbf16>
    %cst = arith.constant dense<0.000000e+00> : vector<16x32xf32>
    %4 = tpu.matmul %2, %3, %cst {dimension_numbers = #tpu.dot_dimension_numbers<[1], [0], [0], [1], [0, 0, 1, 1], [], []>} : vector<16x32xbf16>, vector<32x32xbf16>, vector<16x32xf32> -> vector<16x32xf32>
    %c0_4 = arith.constant 0 : index
    %c0_5 = arith.constant 0 : index
    %5 = vector.load %arg4[%c0_4, %c0_5] : memref<1x32xf32, #tpu.memory_space<vmem>>, vector<1x32xf32>
    %6 = vector.broadcast %5 : vector<1x32xf32> to vector<16x32xf32>
    %7 = arith.addf %4, %6 : vector<16x32xf32>
    %8 = vector.shape_cast %7 : vector<16x32xf32> to vector<2x8x32xf32>
    %9 = arith.mulf %8, %8 : vector<2x8x32xf32>
    %cst_6 = arith.constant dense<0.000000e+00> : vector<2x8xf32>
    %10 = vector.multi_reduction <add>, %9, %cst_6 [2] : vector<2x8x32xf32> to vector<2x8xf32>
    %c0_7 = arith.constant 0 : index
    %c0_8 = arith.constant 0 : index
    %11 = vector.load %arg5[%c0_7, %c0_8] : memref<1x32xf32, #tpu.memory_space<vmem>>, vector<1x32xf32>
    %12 = vector.shape_cast %11 : vector<1x32xf32> to vector<1x1x32xf32>
    %13 = vector.broadcast %12 : vector<1x1x32xf32> to vector<2x8x32xf32>
    %14 = arith.mulf %0, %13 : vector<2x8x32xf32>
    %cst_9 = arith.constant dense<0.000000e+00> : vector<2x8xf32>
    %15 = vector.multi_reduction <add>, %14, %cst_9 [2] : vector<2x8x32xf32> to vector<2x8xf32>
    %c1 = arith.constant 1 : index
    %16 = memref.load %arg1[%c1] : memref<2xf32, #tpu.memory_space<smem>>
    %17 = vector.broadcast %16 : f32 to vector<2x8xf32>
    %18 = arith.addf %15, %17 : vector<2x8xf32>
    %c0_10 = arith.constant 0 : index
    %19 = memref.load %arg1[%c0_10] : memref<2xf32, #tpu.memory_space<smem>>
    %20 = math.sqrt %10 : vector<2x8xf32>
    %21 = vector.broadcast %19 : f32 to vector<2x8xf32>
    %22 = arith.mulf %21, %20 : vector<2x8xf32>
    %cst_11 = arith.constant 9.99999993E-9 : f32
    %23 = vector.broadcast %cst_11 : f32 to vector<2x8xf32>
    %24 = arith.addf %22, %23 : vector<2x8xf32>
    %25 = tpu.reciprocal %24 {approx = true} : vector<2x8xf32> -> vector<2x8xf32>
    %26 = arith.mulf %18, %25 : vector<2x8xf32>
    %cst_12 = arith.constant dense<0xFF800000> : vector<2xf32>
    %27 = vector.multi_reduction <maximumf>, %26, %cst_12 [1] : vector<2x8xf32> to vector<2xf32>
    %28 = vector.shape_cast %27 : vector<2xf32> to vector<2x1xf32>
    %29 = vector.broadcast %28 : vector<2x1xf32> to vector<2x8xf32>
    %30 = arith.subf %26, %29 : vector<2x8xf32>
    %31 = math.exp %30 : vector<2x8xf32>
    %cst_13 = arith.constant dense<0.000000e+00> : vector<2xf32>
    %32 = vector.multi_reduction <add>, %31, %cst_13 [1] : vector<2x8xf32> to vector<2xf32>
    %33 = vector.shape_cast %32 : vector<2xf32> to vector<2x1xf32>
    %cst_14 = arith.constant 1.000000e+00 : f32
    %34 = vector.broadcast %cst_14 : f32 to vector<2x1xf32>
    %35 = arith.divf %34, %33 : vector<2x1xf32>
    %36 = vector.broadcast %35 : vector<2x1xf32> to vector<2x8xf32>
    %37 = arith.mulf %31, %36 : vector<2x8xf32>
    %38 = vector.shape_cast %37 : vector<2x8xf32> to vector<2x8x1xf32>
    %39 = vector.broadcast %38 : vector<2x8x1xf32> to vector<2x8x32xf32>
    %40 = arith.mulf %0, %39 : vector<2x8x32xf32>
    %cst_15 = arith.constant dense<0.000000e+00> : vector<2x32xf32>
    %41 = vector.multi_reduction <add>, %40, %cst_15 [1] : vector<2x8x32xf32> to vector<2x32xf32>
    %c0_16 = arith.constant 0 : index
    %c0_17 = arith.constant 0 : index
    %42 = vector.load %arg6[%c0_16, %c0_17] : memref<2x32xf32, #tpu.memory_space<vmem>>, vector<2x32xf32>
    tpu.vector_store %arg6[%c0_16, %c0_17], %41 {strides = array<i32>} : memref<2x32xf32, #tpu.memory_space<vmem>>, vector<2x32xf32>,
    return
  }
  func.func @transform_0(%arg0: i32, %arg1: memref<2xf32, #tpu.memory_space<smem>>) -> (i32, i32, i32) {
    %c0_i32 = arith.constant 0 : i32
    %c0_i32_0 = arith.constant 0 : i32
    %c0_i32_1 = arith.constant 0 : i32
    return %arg0, %c0_i32, %c0_i32_0 : i32, i32, i32
  }
  func.func @transform_1(%arg0: i32, %arg1: memref<2xf32, #tpu.memory_space<smem>>) -> (i32, i32) {
    %c0_i32 = arith.constant 0 : i32
    %c0_i32_0 = arith.constant 0 : i32
    %c0_i32_1 = arith.constant 0 : i32
    return %c0_i32, %c0_i32_0 : i32, i32
  }
  func.func @transform_2(%arg0: i32, %arg1: memref<2xf32, #tpu.memory_space<smem>>) -> (i32, i32) {
    %c0_i32 = arith.constant 0 : i32
    %c0_i32_0 = arith.constant 0 : i32
    %c0_i32_1 = arith.constant 0 : i32
    return %c0_i32, %c0_i32_0 : i32, i32
  }
  func.func @transform_3(%arg0: i32, %arg1: memref<2xf32, #tpu.memory_space<smem>>) -> (i32, i32) {
    %c0_i32 = arith.constant 0 : i32
    %c0_i32_0 = arith.constant 0 : i32
    %c0_i32_1 = arith.constant 0 : i32
    return %c0_i32, %c0_i32_0 : i32, i32
  }
  func.func @transform_4(%arg0: i32, %arg1: memref<2xf32, #tpu.memory_space<smem>>) -> (i32, i32) {
    %c0_i32 = arith.constant 0 : i32
    %c0_i32_0 = arith.constant 0 : i32
    return %arg0, %c0_i32 : i32, i32
  }
}

</mosaic_0001>

<bundles_post_ra>
// kernel: tpu_custom_call.1
= control target key start
LH: loop header
LB: loop body
LE: loop exit
PB: predicated region body
PF: predicated region fallthrough
CT: control target
= control target key end

     0   :  { %s541_s0 = inlined_call_operand.hbm [shape: f32[2], index: 0, kind: input, shape index: {}]   ;;  %s542_s1 = inlined_call_operand.hbm [shape: f32[2,8,32], index: 1, kind: input, shape index: {}]   ;;  %s543_s2 = inlined_call_operand.hbm [shape: bf16[32,32], index: 2, kind: input, shape index: {}]   ;;  %s544_s3 = inlined_call_operand.vmem [shape: f32[1,32], index: 3, kind: input, shape index: {}]   ;;  %s545_s4 = inlined_call_operand.vmem [shape: f32[1,32], index: 4, kind: input, shape index: {}]   ;;  %s546_s5 = inlined_call_operand.hbm [shape: f32[2,32], index: 5, kind: output, shape index: {}]  }
   0x1   :  { %s340_s20 = scalar_lea.hbm %s541_s0, 16 }
   0x2   :  { %p341_p0 = scmp.ne.s32.totalorder %s541_s0, %s340_s20  ;;  %p344_p1 = scmp.lt.u32.totalorder %s340_s20, %s541_s0 }
   0x4   :  { %p346_p2 = pnand %p344_p1, %p341_p0 }
   0x6   :  { %349 = shalt.err (!%p346_p2)  }
   0x7   :  { %s424_s25 = smov [#allocation3]  }
   0x8   :  { %11 = dma.hbm_to_smem %s541_s0, 16, %s424_s25, [#allocation2] }
   0x9   :  { %416 = dma.done.wait [#allocation2], 16 }
   0xa   :  { %417 = vsyncadd [#allocation2], 4294967280 }
   0xb   :  { %13 = sfence }
   0xc   :  { %14 = vsyncpa [#allocation5], 0 }
   0xd   :  { %15 = vsyncpa [#allocation8], 0 }
   0xe   :  { %16 = vsyncpa [#allocation6], 0  ;;  %s425_s28 = smov [#allocation4]   ;;  %s350_s7 = scalar_lea.hbm %s542_s1, 256 }
   0xf   :  { %s22_s29 = sshll.u32 %s425_s28, 4  ;;  %p351_p3 = scmp.ne.s32.totalorder %s542_s1, %s350_s7  ;;  %s23_s29 = int_to_ptr.vmem [resolvable:$true] %s22_s29 }
  0x10   :  { %p354_p4 = scmp.lt.u32.totalorder %s350_s7, %s542_s1 }
  0x12   :  { %p356_p5 = pnand %p354_p4, %p351_p3 }
  0x14   :  { %359 = shalt.err (!%p356_p5)
}
  0x15   :  { %s360_s0 = scalar_lea.vmem %s23_s29, 256  ;;  %p365_p7 = scmp.lt.s32.totalorder %s23_s29, %s23_s29 }
  0x16   :  { %p361_p6 = scmp.ne.s32.totalorder %s23_s29, %s360_s0  ;;  %p366_p8 = scmp.lt.s32.totalorder %s360_s0, %s360_s0 }
  0x18   :  { %p367_p9 = por %p366_p8, %p365_p7 }
  0x1a   :  { %p368_p10 = pnand %p367_p9, %p361_p6 }
  0x1c   :  { %371 = shalt.err (!%p368_p10)
}
  0x1d   :  { %s426_s12 = smov 128   ;;  %s427_s13 = smov 8  }
  0x1e   :  { %28 = dma.hbm_to_vmem [thread:$0]  %s542_s1, 256, %s23_s29, [#allocation5], %s426_s12, %s426_s12, %s427_s13  }
  0x1f   :  { %s428_s16 = smov [#allocation7]   ;;  %s372_s20 = scalar_lea.hbm %s543_s2, 256 }
  0x20   :  { %s34_s17 = sshll.u32 %s428_s16, 4  ;;  %p373_p11 = scmp.ne.s32.totalorder %s543_s2, %s372_s20  ;;  %s35_s17 = int_to_ptr.vmem [resolvable:$true] %s34_s17 }
  0x21   :  { %p376_p12 = scmp.lt.u32.totalorder %s372_s20, %s543_s2 }
  0x23   :  { %p378_p13 = pnand %p376_p12, %p373_p11 }
  0x25   :  { %381 = shalt.err (!%p378_p13)
}
  0x26   :  { %s382_s25 = scalar_lea.vmem %s35_s17, 256  ;;  %p387_p1 = scmp.lt.s32.totalorder %s35_s17, %s35_s17 }
  0x27   :  { %p383_p0 = scmp.ne.s32.totalorder %s35_s17, %s382_s25  ;;  %p388_p2 = scmp.lt.s32.totalorder %s382_s25, %s382_s25 }
  0x29   :  { %p389_p3 = por %p388_p2, %p387_p1 }
  0x2b   :  { %p390_p4 = pnand %p389_p3, %p383_p0 }
  0x2d   :  { %393 = shalt.err (!%p390_p4)
}
  0x2e   :  { %s429_s1 = smov 64   ;;  %s430_s26 = smov 4  }
  0x2f   :  { %40 = dma.hbm_to_vmem [thread:$0]  %s543_s2, 256, %s35_s17, [#allocation8], %s429_s1, %s429_s1, %s430_s26  }
  0x30   :  { %418 = dma.done.wait [#allocation5], 256  }
  0x31   :  { %419 = vsyncadd [#allocation5], 4294967040 }
  0x32   :  { %420 = dma.done.wait [#allocation8], 256  }
  0x33   :  { %421 = vsyncadd [#allocation8], 4294967040  ;;  %v431_v0 = vmov 0.0   ;;  %vm432_vm0 = vmmov 0   ;;  %v324_v1 = vld [vmem:[#allocation7] sm:$0xff]   ;;  %v325_v2 = vld [vmem:[#allocation7 + $0x8] sm:$0xff]   ;;  %v176_v40 = vlaneseq }
  0x34   :  { %303 = vmatprep.subr.bf16.mxu0 %v431_v0  ;;  %307 = vmatprep.mubr.msk.bf16.mxu0 %vm432_vm0, %v431_v0  ;;  %v501_v3 = vld [vmem:[#allocation4] sm:$0xff]  ;;  %v503_v4 = vld [vmem:[#allocation4 + $0x8] sm:$0xff]  ;;  %vm78_vm1 = vcmask 261120   ;;  %vm186_vm6 = vcmask 1041409   ;;  %vm189_vm7 = vcmask 58368   ;;  %v433_v56 = vmov 0  }
  0x35   :  { %304 = vmatpush3.bf16.msra.mxu0 %v324_v1  ;;  %v54_v5 = vpack.c.bf16 %v503_v4, %v501_v3  ;;  %v298_v6 = vld [vmem:[%s545_s4] ss:$0 sm:$0xff]  ;;  %s150_s4 = sld [smem:[#allocation3]]  ;;  %v177_v43 = vand.u32 127, %v176_v40  ;;  %v179_v44 = vshrl.u32 %v176_v40, 7  ;;  %323 = vset.pattern.permute.xlu0 %v433_v56  ;;  %s434_s7 = smov [#allocation9]  }
  0x36   :  { %305 = vmatprep.subr.bf16.mxu0 %v431_v0  ;;  %v138_v7 = vmul.f32 %v298_v6, %v501_v3  ;;  %v139_v8 = vmul.f32 %v298_v6, %v503_v4  ;;  %v294_v11 = vld [vmem:[%s544_s3] ss:$0 sm:$0xff]  ;;  %s299_s3 = sld [smem:[#allocation3 + $0x1]]  ;;  %322 = vset.pattern.permute.xlu1 %v433_v56  ;;  %s284_s8 = sshll.u32 %s434_s7, 4  ;;  %vm276_vm8 = vcmask 254976   ;;  %s285_s8 = int_to_ptr.vmem [resolvable:$true] %s284_s8 }
  0x37   :  { %v180_v48 = vsub.s32 %v177_v43, %v179_v44  ;;  %v196_v57 = vsub.s32 0, %v179_v44  ;;  %v200_v58 = vsub.s32 1, %v179_v44  ;;  %s394_s9 = scalar_lea.vmem %s285_s8, 32  ;;  %p399_p6 = scmp.lt.s32.totalorder %s285_s8, %s285_s8 }
  0x38   :  { %v140_v9 = vsel %vm78_vm1, %v138_v7, 0.0  ;;  %v143_v10 = vsel %vm78_vm1, %v139_v8, 0.0  ;;  %p395_p5 = scmp.ne.s32.totalorder %s285_s8, %s394_s9  ;;  %p400_p7 = scmp.lt.s32.totalorder %s394_s9, %s394_s9 }
  0x39   :  { %306 = vmatpush3.bf16.msra.mxu0 %v325_v2  ;;  %141 = vadd.xlane.f32.xlu1 %v140_v9 }
  0x3a   :  { %p401_p8 = por %p400_p7, %p399_p6 }
  0x3b   :  { %v165_v27 = vstv %s150_s4 }
  0x3c   :  { %308 = vmatmul.mubr.msk.bf16.vlgmr.msra.gmra.mrb[0].mxu0 %vm78_vm1, %v54_v5  ;;  %v147_v41 = vstv %s299_s3  ;;  %p402_p9 = pnand %p401_p8, %p395_p5 }
  0x3d   :  { %144 = vadd.xlane.f32.xlu1 %v143_v10 }
  0xc6   :  { %v142_v38 = vpop.xlane.xlu1 %141 }
  0xc7   :  { %v148_v45 = vadd.f32 %v147_v41, %v142_v38 }
  0xca   :  { %v145_v42 = vpop.xlane.xlu1 %144 }
  0xcb   :  { %v149_v47 = vadd.f32 %v147_v41, %v145_v42 }
 0x10f   :  { %v116_v12 = vpop.f32.mrb[0].mxu0 }
 0x110   :  { %v117_v13 = vadd.f32 %v294_v11, %v116_v12  ;;  %v309_v14 = vpop.f32.mrb[1].mxu0 }
 0x111   :  { %v119_v15 = vpop.f32.mrb[2].mxu0 }
 0x112   :  { %v123_v16 = vmul.f32 %v117_v13, %v117_v13  ;;  %v120_v17 = vadd.f32 %v294_v11, %v119_v15  ;;  %v310_v18 = vpop.f32.mrb[3].mxu0 }
 0x114   :  { %v124_v19 = vmul.f32 %v120_v17, %v120_v17  ;;  %v125_v20 = vsel %vm78_vm1, %v123_v16, 0.0 }
 0x115   :  { %126 = vadd.xlane.f32.xlu0 %v125_v20 }
 0x116   :  { %v128_v21 = vsel %vm78_vm1, %v124_v19, 0.0 }
 0x119   :  { %129 = vadd.xlane.f32.xlu0 %v128_v21 }
 0x1a2   :  { %v127_v22 = vpop.xlane.xlu0 %126 }
 0x1a3   :  { %326 = vrsqrt.f32 %v127_v22  ;;  %vm153_vm2 = vcmp.eq.f32.partialorder %v127_v22, inf  ;;  %v156_v26 = vand.u32 2147483648, %v127_v22  ;;  %vm155_vm3 = vcmp.eq.f32.partialorder %v127_v22, 0.0 }
 0x1a6   :  { %v130_v23 = vpop.xlane.xlu0 %129 }
 0x1a7   :  { %328 = vrsqrt.f32 %v130_v23  ;;  %vm160_vm4 = vcmp.eq.f32.partialorder %v130_v23, inf  ;;  %v163_v33 = vand.u32 2147483648, %v130_v23  ;;  %vm162_vm5 = vcmp.eq.f32.partialorder %v130_v23, 0.0 }
 0x1ad   :  { %v327_v24 = vpop.eup %326 }
 0x1ae   :  { %v152_v25 = vmul.f32 %v327_v24, %v127_v22 }
 0x1b0   :  { %v154_v28 = vsel %vm153_vm2, %v127_v22, %v152_v25 }
 0x1b1   :  { %v329_v29 = vpop.eup %328  ;;  %v157_v30 = vsel %vm155_vm3, %v156_v26, %v154_v28 }
 0x1b2   :  { %v159_v31 = vmul.f32 %v329_v29, %v130_v23  ;;  %v166_v32 = vmul.f32 %v165_v27, %v157_v30 }
 0x1b4   :  { %v161_v34 = vsel %vm160_vm4, %v130_v23, %v159_v31  ;;  %v168_v35 = vadd.f32 1e-08, %v166_v32 }
 0x1b5   :  { %v164_v36 = vsel %vm162_vm5, %v163_v33, %v161_v34 }
 0x1b6   :  { %330 = vrcp.f32 %v168_v35  ;;  %v167_v37 = vmul.f32 %v165_v27, %v164_v36 }
 0x1b8   :  { %v169_v39 = vadd.f32 1e-08, %v167_v37 }
 0x1ba   :  { %332 = vrcp.f32 %v169_v39 }
 0x1c0   :  { %v331_v46 = vpop.eup %330 }
 0x1c1   :  { %v172_v49 = vmul.f32 %v331_v46, %v148_v45 }
 0x1c3   :  { %v181_v52 = vrot.slane %v172_v49, %v180_v48 }
 0x1c4   :  { %v333_v50 = vpop.eup %332 }
 0x1c5   :  { %v173_v51 = vmul.f32 %v333_v50, %v149_v47 }
 0x1c7   :  { %v185_v53 = vrot.slane %v173_v51, %v180_v48 }
 0x1c9   :  { %v187_v54 = vsel %vm186_vm6, %v185_v53, %v181_v52 }
 0x1ca   :  { %v190_v55 = vsel %vm189_vm7, %v187_v54, -inf }
 0x1cb   :  { %191 = vmax.xlane.f32.xlu0 %v190_v55 }
 0x258   :  { %v192_v59 = vpop.xlane.xlu0 %191 }
 0x259   :  { %v197_v60 = vrot.slane %v192_v59, %v196_v57  ;;  %v201_v61 = vrot.slane %v192_v59, %v200_v58 }
 0x25b   :  { %v204_v62 = vsub.f32 %v172_v49, %v197_v60  ;;  %v205_v63 = vsub.f32 %v173_v51, %v201_v61 }
 0x25d   :  { %v206_v0 = vmul.f32 1.442695, %v204_v62  ;;  %v208_v1 = vmul.f32 1.442695, %v205_v63 }
 0x25f   :  { %334 = vpow2.f32 %v206_v0 }
 0x260   :  { %336 = vpow2.f32 %v208_v1 }
 0x269   :  { %v335_v2 = vpop.eup %334 }
 0x26a   :  { %v337_v5 = vpop.eup %336  ;;  %213 = vperm.xlu1 %322, %v335_v2  }
 0x26b   :  { %216 = vperm.xlu0 %323, %v337_v5  }
 0x2e9   :  { %v214_v6 = vpop.permute.xlu1 %213 }
 0x2ea   :  { %v217_v7 = vpop.permute.xlu0 %216  ;;  %v221_v8 = vrot.slane %v214_v6, %v180_v48 }
 0x2eb   :  { %v225_v9 = vrot.slane %v217_v7, %v180_v48 }
 0x2ed   :  { %v226_v10 = vsel %vm186_vm6, %v225_v9, %v221_v8 }
 0x2ee   :  { %v228_v11 = vsel %vm189_vm7, %v226_v10, 0.0 }
 0x2ef   :  { %229 = vadd.xlane.f32.xlu1 %v228_v11 }
 0x37c   :  { %v230_v12 = vpop.xlane.xlu1 %229 }
 0x37d   :  { %338 = vrcp.f32 %v230_v12 }
 0x387   :  { %v339_v13 = vpop.eup %338 }
 0x388   :  { %v237_v14 = vrot.slane %v339_v13, %v196_v57  ;;  %v241_v16 = vrot.slane %v339_v13, %v200_v58 }
 0x38a   :  { %v244_v15 = vmul.f32 %v335_v2, %v237_v14  ;;  %v245_v17 = vmul.f32 %v337_v5, %v241_v16 }
 0x38c   :  { %248 = vperm.xlu0 %323, %v244_v15  }
 0x390   :  { %253 = vperm.xlu0 %323, %v245_v17  }
 0x40b   :  { %v249_v18 = vpop.permute.xlu0 %248 }
 0x40c   :  { %v256_v19 = vmul.f32 %v249_v18, %v501_v3 }
 0x40e   :  { %v258_v20 = vsel %vm78_vm1, %v256_v19, 0.0 }
 0x40f   :  { %v259_v21 = vrot.slane %v258_v20, 4  ;;  %v254_v22 = vpop.permute.xlu0 %253 }
 0x410   :  { %v257_v23 = vmul.f32 %v254_v22, %v503_v4 }
 0x411   :  { %v260_v24 = vadd.f32 %v259_v21, %v258_v20 }
 0x412   :  { %v265_v25 = vsel %vm78_vm1, %v257_v23, 0.0 }
 0x413   :  { %v261_v26 = vrot.slane %v260_v24, 2  ;;  %v266_v27 = vrot.slane %v265_v25, 4 }
 0x415   :  { %v262_v28 = vadd.f32 %v261_v26, %v260_v24  ;;  %v267_v29 = vadd.f32 %v266_v27, %v265_v25 }
 0x417   :  { %v268_v30 = vrot.slane %v267_v29, 2  ;;  %v263_v31 = vrot.slane %v262_v28, 1 }
 0x419   :  { %v269_v32 = vadd.f32 %v268_v30, %v267_v29  ;;  %v264_v3 = vadd.f32 %v263_v31, %v262_v28 }
 0x41b   :  { %v270_v33 = vrot.slane %v269_v32, 1 }
 0x41d   :  { %v271_v34 = vadd.f32 %v270_v33, %v269_v32 }
 0x41f   :  { %v274_v35 = vsel %vm186_vm6, %v271_v34, %v264_v3 }
 0x420   :  { %277 = vst.msk [vmem:[#allocation9] sm:$0x3] %vm276_vm8, %v274_v35 }
 0x421   :  { %405 = shalt.err (!%p402_p9)
}
 0x422   :  { %s406_s0 = scalar_lea.hbm %s546_s5, 32 }
 0x423   :  { %p407_p10 = scmp.ne.s32.totalorder %s546_s5, %s406_s0  ;;  %p410_p11 = scmp.lt.u32.totalorder %s406_s0, %s546_s5 }
 0x425   :  { %p412_p12 = pnand %p410_p11, %p407_p10 }
 0x427   :  { %415 = shalt.err (!%p412_p12)
}
 0x428   :  { %287 = dma.vmem_to_hbm [thread:$0]  %s285_s8, 32, %s546_s5, [#allocation6]  }
 0x429   :  { %422 = dma.done.wait [#allocation6], 32  }
 0x42a   :  { %423 = vsyncadd [#allocation6], 4294967264 }
 0x42b   :  { %291 = vsyncpa [#allocation5], 1 }
 0x42c   :  { %292 = vsyncpa [#allocation8], 1 }
 0x42d   :  { %293 = vsyncpa [#allocation6], 1 }

</bundles_post_ra>
